<compile_context>
chip_gen: v7x
topology: tpu7x:2x2x1
jax: 0.10.0
libtpu: 0.0.40
codegen_flags: <defaults>
</compile_context>

<pallas_src>
import jax
import jax.numpy as jnp
import numpy as np
from jax.experimental import pallas as pl
from jax.experimental.pallas import tpu as pltpu

# ---- small, TPU-tile-friendly sizes -----------------------------------------
B  = 2      # batch
S  = 16     # state dim
N  = 128    # number of points in the point cloud
Dp = 8      # per-point feature dim
G  = 16     # coeff_gt dim
I  = 8      # init_state_ego dim
Hp, Fp = 128, 128   # pointnet hidden / pooled feature dim
He, L  = 128, 16    # encoder hidden / latent dim
Hd, Y  = 128, 16    # decoder hidden / output dim (y_star matches coeff_gt)
assert Y == L and 3 * L <= 128

# ---- packed side-input lane layout: [state | gt | state | init | eps] -------
_SIDE_ENC = 0                  # lanes [0, S+G)        -> encoder [state|gt]
_SIDE_DEC = S + G              # lanes [S+G, S+G+S+I)  -> decoder [state|init]
_SIDE_EPS = S + G + S + I      # lanes [.., ..+L)      -> eps
SIDE_W    = _SIDE_EPS + L      # 72


def _align16(x):               # bf16 sublane tile is 16 rows -> keep slices aligned
    return ((x + 15) // 16) * 16


# ---- packed weight-slab row offsets (all 16-aligned) -------------------------
_PN_W1  = 0                                   # (Dp, 128)
_PN_W2  = _align16(_PN_W1 + Dp)               # (Hp, 128)        @ 16
_ENC_W1 = _align16(_PN_W2 + Hp)               # (Fp+S+G, 128)    @ 144
_DEC_WA = _align16(_ENC_W1 + Fp + S + G)      # (Fp+S+I, 128)    @ 304
_DEC_WZ = _align16(_DEC_WA + Fp + S + I)      # (L, 128)         @ 464
_W_ROWS = _align16(_DEC_WZ + L)               # 480

# ---- packed bias rows (8, 128) f32 -------------------------------------------
_B_PN1, _B_PN2, _B_ENC1, _B_DEC1, _B_HEADS = 0, 1, 2, 3, 4


# ------------------------------ fused kernel ---------------------------------
def _fused_kernel(pcd_ref, side_ref, w_ref, heads_ref, bias_ref, out_ref):
    f32, bf16 = jnp.float32, jnp.bfloat16

    # -- PointNet on flattened (B*N, Dp) points (min/max scaling folded into w1/b1)
    w1 = w_ref[pl.ds(_PN_W1, Dp), :]
    h = jnp.dot(pcd_ref[...].astype(bf16), w1, preferred_element_type=f32)
    h = jnp.maximum(h + bias_ref[pl.ds(_B_PN1, 1), :], 0.0)

    w2 = w_ref[pl.ds(_PN_W2, Hp), :]
    f = jnp.dot(h.astype(bf16), w2, preferred_element_type=f32)
    # pn_b2 + ReLU deferred past the symmetric max-pool (exact: both commute with max)
    feat = jnp.max(f.reshape(B, N, Fp), axis=1)
    feat = jnp.maximum(feat + bias_ref[pl.ds(_B_PN2, 1), :], 0.0)          # (B, Fp)

    # -- Encoder: single K=Fp+S+G matmul over [feat | state | gt]
    #    (state normalization folded into the state rows / bias at prep time;
    #     concat boundary sits exactly at lane 128 -> layout-free)
    enc_in = jnp.concatenate([feat, side_ref[:, pl.ds(_SIDE_ENC, S + G)]], axis=-1)
    we1 = w_ref[pl.ds(_ENC_W1, Fp + S + G), :]
    he = jnp.dot(enc_in.astype(bf16), we1, preferred_element_type=f32)
    he = jnp.maximum(he + bias_ref[pl.ds(_B_ENC1, 1), :], 0.0)

    # -- Fused [mean | logvar | dec_w2] head: one (128,48) matmul, static lane slices
    head_b = bias_ref[pl.ds(_B_HEADS, 1), pl.ds(0, 3 * L)]                 # (1, 48)
    enc_out = (jnp.dot(he.astype(bf16), heads_ref[...], preferred_element_type=f32)
               + head_b)
    mean = enc_out[:, :L]
    std = jnp.exp(0.5 * enc_out[:, L:2 * L])                               # std > 0

    # -- Reparametrize: z = mean + std * eps
    z = mean + std * side_ref[:, pl.ds(_SIDE_EPS, L)]

    # -- Decoder: K=Fp+S+I matmul over [feat | state | init] + K=L matmul over z
    dec_in = jnp.concatenate([feat, side_ref[:, pl.ds(_SIDE_DEC, S + I)]], axis=-1)
    wa = w_ref[pl.ds(_DEC_WA, Fp + S + I), :]
    wz = w_ref[pl.ds(_DEC_WZ, L), :]
    hd = (jnp.dot(dec_in.astype(bf16), wa, preferred_element_type=f32)
          + jnp.dot(z.astype(bf16), wz, preferred_element_type=f32)
          + bias_ref[pl.ds(_B_DEC1, 1), :])
    hd = jnp.maximum(hd, 0.0)
    dec_out = (jnp.dot(hd.astype(bf16), heads_ref[...], preferred_element_type=f32)
               + head_b)
    y = dec_out[:, 2 * L:3 * L]

    # -- One packed output write: [mean | std | y_star]  -> (B, 3*L)
    out_ref[...] = jnp.concatenate([mean, std, y], axis=-1)


# ------------------------------- wrapper --------------------------------------
def beta_cvae_forward(kparams, state, pcd, coeff_gt, init_state_ego, eps):
    # Cheap wrapper-side plumbing only: flatten points, pack the small lane-dense
    # side inputs into ONE array (everything heavy happens inside the kernel).
    pcd_flat = pcd.reshape(B * N, Dp)
    side = jnp.concatenate([state, coeff_gt, state, init_state_ego, eps], axis=1)
    args = (pcd_flat, side, kparams["w_slab"], kparams["heads"], kparams["bias"])

    flops = 2 * (B * N * Dp * Hp + B * N * Hp * Fp
                 + B * (Fp + S + G) * He + B * He * 3 * L
                 + B * (Fp + S + I) * Hd + B * L * Hd + B * Hd * 3 * L)
    bytes_accessed = (sum(int(np.prod(a.shape)) * a.dtype.itemsize for a in args)
                      + B * 3 * L * 4)

    vmem = pl.BlockSpec(memory_space=pltpu.MemorySpace.VMEM)
    out = pl.pallas_call(
        _fused_kernel,
        out_shape=jax.ShapeDtypeStruct((B, 3 * L), jnp.float32),
        in_specs=[vmem] * len(args),
        out_specs=vmem,
        cost_estimate=pl.CostEstimate(flops=flops,
                                      transcendentals=B * L,
                                      bytes_accessed=bytes_accessed),
    )(*args)
    return out[:, :L], out[:, L:2 * L], out[:, 2 * L:]


# ----------------- exact folding + packing of parameters ----------------------
def prepare_kernel_params(p, weight_dtype=jnp.bfloat16):
    # Fold pcd scaling: (pcd - min)/range @ W1 + b1
    #   == pcd @ (diag(1/range) W1) + (b1 - (min/range) @ W1)
    rng = p["max_pcd"] - p["min_pcd"]
    # NOTE: PyTorch would propagate inf/NaN for a zero range; we substitute
    # identity scaling for degenerate features (documented behavioral divergence).
    rng = jnp.where(rng == 0.0, 1.0, rng)
    pn_w1 = p["pn_w1"] * (1.0 / rng).reshape(Dp, 1)
    pn_b1 = p["pn_b1"] - (p["min_pcd"] / rng) @ p["pn_w1"]

    # Fold state normalization into the state rows of encoder/decoder layer 1.
    inv_sstd = (1.0 / p["state_std"]).reshape(S, 1)
    m_over_s = p["state_mean"] / p["state_std"]
    enc_ws = p["enc_ws"] * inv_sstd
    enc_b1 = p["enc_b1"] - m_over_s @ p["enc_ws"]
    dec_ws = p["dec_ws"] * inv_sstd
    dec_b1 = p["dec_b1"] - m_over_s @ p["dec_ws"]

    # One (480,128) weight slab; 16-aligned row offsets => free in-kernel slices.
    w = jnp.zeros((_W_ROWS, 128), jnp.float32)
    w = w.at[_PN_W1:_PN_W1 + Dp].set(pn_w1)
    w = w.at[_PN_W2:_PN_W2 + Hp].set(p["pn_w2"])
    w = w.at[_ENC_W1:_ENC_W1 + Fp + S + G].set(
        jnp.concatenate([p["enc_wf"], enc_ws, p["enc_wg"]], axis=0))
    w = w.at[_DEC_WA:_DEC_WA + Fp + S + I].set(
        jnp.concatenate([p["dec_wf"], dec_ws, p["dec_wi"]], axis=0))
    w = w.at[_DEC_WZ:_DEC_WZ + L].set(p["dec_wz"])

    # One (128, 48) head slab: [enc_wm | enc_wv | dec_w2].
    heads = jnp.concatenate([p["enc_wm"], p["enc_wv"], p["dec_w2"]], axis=1)

    # One (8, 128) f32 bias block (biases stay f32: added to f32 accumulators).
    bias = jnp.zeros((8, 128), jnp.float32)
    bias = bias.at[_B_PN1, :Hp].set(pn_b1[0])
    bias = bias.at[_B_PN2, :Fp].set(p["pn_b2"][0])
    bias = bias.at[_B_ENC1, :He].set(enc_b1[0])
    bias = bias.at[_B_DEC1, :Hd].set(dec_b1[0])
    bias = bias.at[_B_HEADS, :3 * L].set(
        jnp.concatenate([p["enc_bm"], p["enc_bv"], p["dec_b2"]], axis=1)[0])

    return {"w_slab": w.astype(weight_dtype),
            "heads": heads.astype(weight_dtype),
            "bias": bias}


# ----------------------- deterministic parameter init ------------------------
def init_params(key):
    ks = jax.random.split(key, 16)
    n = lambda k, shp, sc=0.1: (sc * jax.random.normal(k, shp)).astype(jnp.float32)
    return {
        "state_mean": n(ks[0], (1, S), 0.5),
        "state_std":  jnp.ones((1, S), jnp.float32) * 2.0,
        "min_pcd":    -jnp.ones((1, Dp), jnp.float32),
        "max_pcd":    jnp.ones((1, Dp), jnp.float32) * 3.0,
        # pointnet
        "pn_w1": n(ks[1], (Dp, Hp)), "pn_b1": n(ks[2], (1, Hp)),
        "pn_w2": n(ks[3], (Hp, Fp)), "pn_b2": n(ks[4], (1, Fp)),
        # encoder
        "enc_ws": n(ks[5], (S, He)), "enc_wf": n(ks[6], (Fp, He)),
        "enc_wg": n(ks[7], (G, He)), "enc_b1": n(ks[8], (1, He)),
        "enc_wm": n(ks[9], (He, L)), "enc_bm": jnp.zeros((1, L), jnp.float32),
        "enc_wv": n(ks[10], (He, L)), "enc_bv": jnp.zeros((1, L), jnp.float32),
        # decoder
        "dec_wz": n(ks[11], (L, Hd)), "dec_ws": n(ks[12], (S, Hd)),
        "dec_wf": n(ks[13], (Fp, Hd)), "dec_wi": n(ks[14], (I, Hd)),
        "dec_b1": jnp.zeros((1, Hd), jnp.float32),
        "dec_w2": n(ks[15], (Hd, Y)), "dec_b2": jnp.zeros((1, Y), jnp.float32),
    }


# --------------- pure-JAX reference (original, unfolded f32 math) -------------
def _reference(p, state, pcd, gt, init, eps):
    state_norm = (state - p["state_mean"]) / p["state_std"]
    scaled = (pcd - p["min_pcd"]) / (p["max_pcd"] - p["min_pcd"])
    h = jnp.maximum(jnp.einsum("bnd,dh->bnh", scaled, p["pn_w1"]) + p["pn_b1"], 0.0)
    f = jnp.maximum(jnp.einsum("bnh,hf->bnf", h, p["pn_w2"]) + p["pn_b2"], 0.0)
    feat = jnp.max(f, axis=1)
    enc_in = jnp.concatenate([state_norm, feat, gt], axis=1)
    w1 = jnp.concatenate([p["enc_ws"], p["enc_wf"], p["enc_wg"]], axis=0)
    he = jnp.maximum(enc_in @ w1 + p["enc_b1"], 0.0)
    mean = he @ p["enc_wm"] + p["enc_bm"]
    std = jnp.exp(0.5 * (he @ p["enc_wv"] + p["enc_bv"]))
    z = mean + std * eps
    dec_in = jnp.concatenate([z, state_norm, feat, init], axis=1)
    wd = jnp.concatenate([p["dec_wz"], p["dec_ws"], p["dec_wf"], p["dec_wi"]], axis=0)
    hd = jnp.maximum(dec_in @ wd + p["dec_b1"], 0.0)
    y = hd @ p["dec_w2"] + p["dec_b2"]
    return mean, std, y


if __name__ == "__main__":
    key = jax.random.PRNGKey(0)
    k_state, k_pcd, k_gt, k_init, k_eps = jax.random.split(key, 5)

    state = jax.random.normal(k_state, (B, S), jnp.float32)
    pcd = jax.random.uniform(k_pcd, (B, N, Dp), jnp.float32, minval=-1.0, maxval=3.0)
    coeff_gt = jax.random.normal(k_gt, (B, G), jnp.float32)
    init_state_ego = jax.random.normal(k_init, (B, I), jnp.float32)
    # eps ~ randn_like(mean): deterministic host-side sample (torch.randn_like equiv)
    eps = jax.random.normal(k_eps, (B, L), jnp.float32)

    native = init_params(jax.random.PRNGKey(42))      # original module parameters
    kparams = prepare_kernel_params(native)           # one-time fold + pack (bf16 weights)

    mean, std, y_star = jax.block_until_ready(
        jax.jit(beta_cvae_forward)(kparams, state, pcd, coeff_gt, init_state_ego, eps))

    # bf16 weights => loosened tolerance vs. the f32 unfolded reference.
    rm, rs, ry = _reference(native, state, pcd, coeff_gt, init_state_ego, eps)
    np.testing.assert_allclose(np.asarray(mean), np.asarray(rm), rtol=5e-2, atol=5e-2)
    np.testing.assert_allclose(np.asarray(std), np.asarray(rs), rtol=5e-2, atol=5e-2)
    np.testing.assert_allclose(np.asarray(y_star), np.asarray(ry), rtol=5e-2, atol=5e-2)

    print("KERNEL_OK")
</pallas_src>

<mosaic_0001>
module attributes {stable_mosaic.version = 11 : i64} {
  func.func @_fused_kernel(%arg0: memref<256x8xf32, #tpu.memory_space<vmem>>, %arg1: memref<2x72xf32, #tpu.memory_space<vmem>>, %arg2: memref<480x128xbf16, #tpu.memory_space<vmem>>, %arg3: memref<128x48xbf16, #tpu.memory_space<vmem>>, %arg4: memref<8x128xf32, #tpu.memory_space<vmem>>, %arg5: memref<2x48xf32, #tpu.memory_space<vmem>>) attributes {dimension_semantics = [], scalar_prefetch = 0 : i64, scratch_operands = 0 : i64, tpu.core_type = #tpu.core_type<tc>} {
    %c0 = arith.constant 0 : index
    %c0_0 = arith.constant 0 : index
    %0 = vector.load %arg2[%c0, %c0_0] : memref<480x128xbf16, #tpu.memory_space<vmem>>, vector<8x128xbf16>
    %c0_1 = arith.constant 0 : index
    %c0_2 = arith.constant 0 : index
    %1 = vector.load %arg0[%c0_1, %c0_2] : memref<256x8xf32, #tpu.memory_space<vmem>>, vector<256x8xf32>
    %2 = arith.truncf %1 : vector<256x8xf32> to vector<256x8xbf16>
    %cst = arith.constant dense<0.000000e+00> : vector<256x128xf32>
    %3 = tpu.matmul %2, %0, %cst {dimension_numbers = #tpu.dot_dimension_numbers<[1], [0], [0], [1], [0, 0, 1, 1], [], []>} : vector<256x8xbf16>, vector<8x128xbf16>, vector<256x128xf32> -> vector<256x128xf32>
    %c0_3 = arith.constant 0 : index
    %c0_4 = arith.constant 0 : index
    %4 = vector.load %arg4[%c0_3, %c0_4] : memref<8x128xf32, #tpu.memory_space<vmem>>, vector<1x128xf32>
    %5 = vector.broadcast %4 : vector<1x128xf32> to vector<256x128xf32>
    %6 = arith.addf %3, %5 : vector<256x128xf32>
    %cst_5 = arith.constant 0.000000e+00 : f32
    %7 = vector.broadcast %cst_5 : f32 to vector<256x128xf32>
    %8 = arith.maximumf %6, %7 : vector<256x128xf32>
    %c16 = arith.constant 16 : index
    %c0_6 = arith.constant 0 : index
    %9 = vector.load %arg2[%c16, %c0_6] : memref<480x128xbf16, #tpu.memory_space<vmem>>, vector<128x128xbf16>
    %10 = arith.truncf %8 : vector<256x128xf32> to vector<256x128xbf16>
    %cst_7 = arith.constant dense<0.000000e+00> : vector<256x128xf32>
    %11 = tpu.matmul %10, %9, %cst_7 {dimension_numbers = #tpu.dot_dimension_numbers<[1], [0], [0], [1], [0, 0, 1, 1], [], []>} : vector<256x128xbf16>, vector<128x128xbf16>, vector<256x128xf32> -> vector<256x128xf32>
    %12 = vector.shape_cast %11 : vector<256x128xf32> to vector<2x128x128xf32>
    %cst_8 = arith.constant dense<0xFF800000> : vector<2x128xf32>
    %13 = vector.multi_reduction <maximumf>, %12, %cst_8 [1] : vector<2x128x128xf32> to vector<2x128xf32>
    %c1 = arith.constant 1 : index
    %c0_9 = arith.constant 0 : index
    %14 = vector.load %arg4[%c1, %c0_9] : memref<8x128xf32, #tpu.memory_space<vmem>>, vector<1x128xf32>
    %15 = vector.broadcast %14 : vector<1x128xf32> to vector<2x128xf32>
    %16 = arith.addf %13, %15 : vector<2x128xf32>
    %cst_10 = arith.constant 0.000000e+00 : f32
    %17 = vector.broadcast %cst_10 : f32 to vector<2x128xf32>
    %18 = arith.maximumf %16, %17 : vector<2x128xf32>
    %c0_11 = arith.constant 0 : index
    %c0_12 = arith.constant 0 : index
    %19 = vector.load %arg1[%c0_11, %c0_12] : memref<2x72xf32, #tpu.memory_space<vmem>>, vector<2x32xf32>
    %20 = tpu.concatenate %18, %19 in 1 : vector<2x128xf32>, vector<2x32xf32> -> vector<2x160xf32>
    %c144 = arith.constant 144 : index
    %c0_13 = arith.constant 0 : index
    %21 = vector.load %arg2[%c144, %c0_13] : memref<480x128xbf16, #tpu.memory_space<vmem>>, vector<160x128xbf16>
    %22 = arith.truncf %20 : vector<2x160xf32> to vector<2x160xbf16>
    %cst_14 = arith.constant dense<0.000000e+00> : vector<2x128xf32>
    %23 = tpu.matmul %22, %21, %cst_14 {dimension_numbers = #tpu.dot_dimension_numbers<[1], [0], [0], [1], [0, 0, 1, 1], [], []>} : vector<2x160xbf16>, vector<160x128xbf16>, vector<2x128xf32> -> vector<2x128xf32>
    %c2 = arith.constant 2 : index
    %c0_15 = arith.constant 0 : index
    %24 = vector.load %arg4[%c2, %c0_15] : memref<8x128xf32, #tpu.memory_space<vmem>>, vector<1x128xf32>
    %25 = vector.broadcast %24 : vector<1x128xf32> to vector<2x128xf32>
    %26 = arith.addf %23, %25 : vector<2x128xf32>
    %cst_16 = arith.constant 0.000000e+00 : f32
    %27 = vector.broadcast %cst_16 : f32 to vector<2x128xf32>
    %28 = arith.maximumf %26, %27 : vector<2x128xf32>
    %c4 = arith.constant 4 : index
    %c0_17 = arith.constant 0 : index
    %29 = vector.load %arg4[%c4, %c0_17] : memref<8x128xf32, #tpu.memory_space<vmem>>, vector<1x48xf32>
    %30 = arith.truncf %28 : vector<2x128xf32> to vector<2x128xbf16>
    %c0_18 = arith.constant 0 : index
    %c0_19 = arith.constant 0 : index
    %31 = vector.load %arg3[%c0_18, %c0_19] : memref<128x48xbf16, #tpu.memory_space<vmem>>, vector<128x48xbf16>
    %cst_20 = arith.constant dense<0.000000e+00> : vector<2x48xf32>
    %32 = tpu.matmul %30, %31, %cst_20 {dimension_numbers = #tpu.dot_dimension_numbers<[1], [0], [0], [1], [0, 0, 1, 1], [], []>} : vector<2x128xbf16>, vector<128x48xbf16>, vector<2x48xf32> -> vector<2x48xf32>
    %33 = vector.broadcast %29 : vector<1x48xf32> to vector<2x48xf32>
    %34 = arith.addf %32, %33 : vector<2x48xf32>
    %35 = vector.extract_strided_slice %34 {offsets = [0, 0], sizes = [2, 16], strides = [1, 1]} : vector<2x48xf32> to vector<2x16xf32>
    %36 = vector.extract_strided_slice %34 {offsets = [0, 16], sizes = [2, 16], strides = [1, 1]} : vector<2x48xf32> to vector<2x16xf32>
    %cst_21 = arith.constant 5.000000e-01 : f32
    %37 = vector.broadcast %cst_21 : f32 to vector<2x16xf32>
    %38 = arith.mulf %37, %36 : vector<2x16xf32>
    %39 = math.exp %38 : vector<2x16xf32>
    %c0_22 = arith.constant 0 : index
    %c56 = arith.constant 56 : index
    %40 = vector.load %arg1[%c0_22, %c56] : memref<2x72xf32, #tpu.memory_space<vmem>>, vector<2x16xf32>
    %41 = arith.mulf %39, %40 : vector<2x16xf32>
    %42 = arith.addf %35, %41 : vector<2x16xf32>
    %c0_23 = arith.constant 0 : index
    %c32 = arith.constant 32 : index
    %43 = vector.load %arg1[%c0_23, %c32] : memref<2x72xf32, #tpu.memory_space<vmem>>, vector<2x24xf32>
    %44 = tpu.concatenate %18, %43 in 1 : vector<2x128xf32>, vector<2x24xf32> -> vector<2x152xf32>
    %c304 = arith.constant 304 : index
    %c0_24 = arith.constant 0 : index
    %45 = vector.load %arg2[%c304, %c0_24] : memref<480x128xbf16, #tpu.memory_space<vmem>>, vector<152x128xbf16>
    %c464 = arith.constant 464 : index
    %c0_25 = arith.constant 0 : index
    %46 = vector.load %arg2[%c464, %c0_25] : memref<480x128xbf16, #tpu.memory_space<vmem>>, vector<16x128xbf16>
    %47 = arith.truncf %44 : vector<2x152xf32> to vector<2x152xbf16>
    %cst_26 = arith.constant dense<0.000000e+00> : vector<2x128xf32>
    %48 = tpu.matmul %47, %45, %cst_26 {dimension_numbers = #tpu.dot_dimension_numbers<[1], [0], [0], [1], [0, 0, 1, 1], [], []>} : vector<2x152xbf16>, vector<152x128xbf16>, vector<2x128xf32> -> vector<2x128xf32>
    %49 = arith.truncf %42 : vector<2x16xf32> to vector<2x16xbf16>
    %cst_27 = arith.constant dense<0.000000e+00> : vector<2x128xf32>
    %50 = tpu.matmul %49, %46, %cst_27 {dimension_numbers = #tpu.dot_dimension_numbers<[1], [0], [0], [1], [0, 0, 1, 1], [], []>} : vector<2x16xbf16>, vector<16x128xbf16>, vector<2x128xf32> -> vector<2x128xf32>
    %51 = arith.addf %48, %50 : vector<2x128xf32>
    %c3 = arith.constant 3 : index
    %c0_28 = arith.constant 0 : index
    %52 = vector.load %arg4[%c3, %c0_28] : memref<8x128xf32, #tpu.memory_space<vmem>>, vector<1x128xf32>
    %53 = vector.broadcast %52 : vector<1x128xf32> to vector<2x128xf32>
    %54 = arith.addf %51, %53 : vector<2x128xf32>
    %cst_29 = arith.constant 0.000000e+00 : f32
    %55 = vector.broadcast %cst_29 : f32 to vector<2x128xf32>
    %56 = arith.maximumf %54, %55 : vector<2x128xf32>
    %57 = arith.truncf %56 : vector<2x128xf32> to vector<2x128xbf16>
    %c0_30 = arith.constant 0 : index
    %c0_31 = arith.constant 0 : index
    %58 = vector.load %arg3[%c0_30, %c0_31] : memref<128x48xbf16, #tpu.memory_space<vmem>>, vector<128x48xbf16>
    %cst_32 = arith.constant dense<0.000000e+00> : vector<2x48xf32>
    %59 = tpu.matmul %57, %58, %cst_32 {dimension_numbers = #tpu.dot_dimension_numbers<[1], [0], [0], [1], [0, 0, 1, 1], [], []>} : vector<2x128xbf16>, vector<128x48xbf16>, vector<2x48xf32> -> vector<2x48xf32>
    %60 = vector.broadcast %29 : vector<1x48xf32> to vector<2x48xf32>
    %61 = arith.addf %59, %60 : vector<2x48xf32>
    %62 = vector.extract_strided_slice %61 {offsets = [0, 32], sizes = [2, 16], strides = [1, 1]} : vector<2x48xf32> to vector<2x16xf32>
    %63 = tpu.concatenate %35, %39, %62 in 1 : vector<2x16xf32>, vector<2x16xf32>, vector<2x16xf32> -> vector<2x48xf32>
    %c0_33 = arith.constant 0 : index
    %c0_34 = arith.constant 0 : index
    %64 = vector.load %arg5[%c0_33, %c0_34] : memref<2x48xf32, #tpu.memory_space<vmem>>, vector<2x48xf32>
    tpu.vector_store %arg5[%c0_33, %c0_34], %63 {strides = array<i32>} : memref<2x48xf32, #tpu.memory_space<vmem>>, vector<2x48xf32>,
    return
  }
}

</mosaic_0001>

<bundles_post_ra>
// kernel: beta_cvae_forward.1
= control target key start
LH: loop header
LB: loop body
LE: loop exit
PB: predicated region body
PF: predicated region fallthrough
CT: control target
= control target key end

     0   :  { %vm124_vm0 = vcmask 1043456   ;;  %vm75_vm1 = vcmask 64512   ;;  %vm707_vm2 = vcmask 261120   ;;  %vm617_vm3 = vcmask 1041409   ;;  %s1410_s13 = smov 88   ;;  %s1411_s18 = smov 96   ;;  %s1826_s2 = inlined_call_operand.vmem [shape: bf16[480,128], index: 2, kind: input, shape index: {}]   ;;  %s1827_s0 = inlined_call_operand.vmem [shape: f32[256,8], index: 0, kind: input, shape index: {}]   ;;  %s1828_s4 = inlined_call_operand.vmem [shape: f32[8,128], index: 4, kind: input, shape index: {}]   ;;  %s1829_s1 = inlined_call_operand.vmem [shape: f32[2,72], index: 1, kind: input, shape index: {}]   ;;  %s1830_s3 = inlined_call_operand.vmem [shape: bf16[128,48], index: 3, kind: input, shape index: {}]   ;;  %s1831_s5 = inlined_call_operand.vmem [shape: f32[2,48], index: 5, kind: output, shape index: {}]  }
   0x1   :  { %v21_v0 = vld [vmem:[%s1826_s2] sm:$0xf]  ;;  %v23_v2 = vld [vmem:[%s1827_s0 + $0x8] sm:$0xff]  ;;  %v24_v5 = vld [vmem:[%s1827_s0 + $0x10] sm:$0xff]  ;;  %vm1409_vm4 = vmmov 0   ;;  %s1412_s21 = smov 112  }
   0x2   :  { %v22_v1 = vld [vmem:[%s1827_s0] sm:$0xff]  ;;  %1361 = vmatprep.subr.msk.bf16.mxu0 %vm124_vm0, %v21_v0  ;;  %v126_v3 = vsel %vm124_vm0, %v21_v0, 0  ;;  %v25_v6 = vld [vmem:[%s1827_s0 + $0x18] sm:$0xff]  ;;  %v27_v9 = vld [vmem:[%s1827_s0 + $0x28] sm:$0xff]  ;;  %vm1008_vm5 = vcmask 195584   ;;  %vm907_vm6 = vcmask 130048  }
   0x3   :  { %v54_v4 = vpack.c.bf16 %v23_v2, %v22_v1  ;;  %v26_v7 = vld [vmem:[%s1827_s0 + $0x20] sm:$0xff]  ;;  %1234 = vmatpush3.bf16.msra.mxu0 %v126_v3  ;;  %v55_v8 = vpack.c.bf16 %v25_v6, %v24_v5  ;;  %v28_v11 = vld [vmem:[%s1827_s0 + $0x30] sm:$0xff]  ;;  %v29_v12 = vld [vmem:[%s1827_s0 + $0x38] sm:$0xff]  ;;  %vm1105_vm7 = vcmask 386048  }
   0x4   :  { %v56_v10 = vpack.c.bf16 %v27_v9, %v26_v7  ;;  %v30_v13 = vld [vmem:[%s1827_s0 + $0x40] sm:$0xff]  ;;  %v31_v14 = vld [vmem:[%s1827_s0 + $0x48] sm:$0xff]  ;;  %v57_v15 = vpack.c.bf16 %v29_v12, %v28_v11  ;;  %v32_v18 = vld [vmem:[%s1827_s0 + $0x50] sm:$0xff] }
   0x5   :  { %1235 = vmatprep.mubr.msk.bf16.mxu0 %vm75_vm1, %v54_v4  ;;  %v58_v16 = vpack.c.bf16 %v31_v14, %v30_v13  ;;  %v1368_v17 = vld [vmem:[%s1826_s2 + $0x8] sm:$0xff]   ;;  %v33_v19 = vld [vmem:[%s1827_s0 + $0x58] sm:$0xff]  ;;  %v1369_v20 = vld [vmem:[%s1826_s2 + $0x10] sm:$0xff]  }
   0x6   :  { %1236 = vmatmul.mubr.msk.bf16.vlgmr.msra.gmra.mrb[0].mxu0 %vm75_vm1, %v55_v8  ;;  %v34_v21 = vld [vmem:[%s1827_s0 + $0x60] sm:$0xff]  ;;  %1267 = vmatprep.subr.bf16.mxu1 %v1368_v17  ;;  %v35_v22 = vld [vmem:[%s1827_s0 + $0x68] sm:$0xff]  ;;  %v1370_v23 = vld [vmem:[%s1826_s2 + $0x18] sm:$0xff]   ;;  %v59_v24 = vpack.c.bf16 %v33_v19, %v32_v18 }
   0x7   :  { %1239 = vmatprep.mubr.msk.bf16.mxu0 %vm75_vm1, %v56_v10  ;;  %1268 = vmatpush3.bf16.msra.mxu1 %v1368_v17  ;;  %v1371_v25 = vld [vmem:[%s1826_s2 + $0x20] sm:$0xff]   ;;  %v60_v26 = vpack.c.bf16 %v35_v22, %v34_v21  ;;  %v36_v27 = vld [vmem:[%s1827_s0 + $0x70] sm:$0xff]  ;;  %v37_v28 = vld [vmem:[%s1827_s0 + $0x78] sm:$0xff] }
   0x8   :  { %1269 = vmatprep.subr.bf16.mxu1 %v1369_v20  ;;  %v38_v29 = vld [vmem:[%s1827_s0 + $0x80] sm:$0xff]  ;;  %v39_v30 = vld [vmem:[%s1827_s0 + $0x88] sm:$0xff]  ;;  %v61_v32 = vpack.c.bf16 %v37_v28, %v36_v27  ;;  %v1373_v33 = vld [vmem:[%s1826_s2 + $0x30] sm:$0xff]  }
   0x9   :  { %v1372_v31 = vld [vmem:[%s1826_s2 + $0x28] sm:$0xff]   ;;  %v62_v34 = vpack.c.bf16 %v39_v30, %v38_v29  ;;  %v40_v35 = vld [vmem:[%s1827_s0 + $0x90] sm:$0xff]  ;;  %v41_v36 = vld [vmem:[%s1827_s0 + $0x98] sm:$0xff] }
   0xa   :  { %v42_v37 = vld [vmem:[%s1827_s0 + $0xa0] sm:$0xff]  ;;  %v43_v38 = vld [vmem:[%s1827_s0 + $0xa8] sm:$0xff]  ;;  %v63_v39 = vpack.c.bf16 %v41_v36, %v40_v35  ;;  %v44_v41 = vld [vmem:[%s1827_s0 + $0xb0] sm:$0xff] }
   0xb   :  { %1270 = vmatpush3.bf16.msra.mxu1 %v1369_v20  ;;  %v64_v40 = vpack.c.bf16 %v43_v38, %v42_v37  ;;  %v45_v42 = vld [vmem:[%s1827_s0 + $0xb8] sm:$0xff]  ;;  %v46_v43 = vld [vmem:[%s1827_s0 + $0xc0] sm:$0xff]  ;;  %v47_v44 = vld [vmem:[%s1827_s0 + $0xc8] sm:$0xff] }
   0xc   :  { %1271 = vmatprep.subr.bf16.mxu1 %v1370_v23  ;;  %v65_v45 = vpack.c.bf16 %v45_v42, %v44_v41  ;;  %v66_v46 = vpack.c.bf16 %v47_v44, %v46_v43  ;;  %v48_v47 = vld [vmem:[%s1827_s0 + $0xd0] sm:$0xff]  ;;  %v49_v48 = vld [vmem:[%s1827_s0 + $0xd8] sm:$0xff]  ;;  %v50_v49 = vld [vmem:[%s1827_s0 + $0xe0] sm:$0xff] }
   0xd   :  { %v51_v50 = vld [vmem:[%s1827_s0 + $0xe8] sm:$0xff]  ;;  %v67_v51 = vpack.c.bf16 %v49_v48, %v48_v47  ;;  %v52_v53 = vld [vmem:[%s1827_s0 + $0xf0] sm:$0xff]  ;;  %v53_v54 = vld [vmem:[%s1827_s0 + $0xf8] sm:$0xff] }
   0xe   :  { %1240 = vmatmul.mubr.msk.bf16.gmra.mrb[4].mxu0 %vm75_vm1, %v57_v15  ;;  %v68_v52 = vpack.c.bf16 %v51_v50, %v50_v49  ;;  %v69_v55 = vpack.c.bf16 %v53_v54, %v52_v53  ;;  %v1374_v56 = vld [vmem:[%s1826_s2 + $0x38] sm:$0xff]   ;;  %v1375_v57 = vld [vmem:[%s1826_s2 + $0x40] sm:$0xff]  }
   0xf   :  { %1243 = vmatprep.mubr.msk.bf16.mxu0 %vm75_vm1, %v58_v16  ;;  %1272 = vmatpush3.bf16.msra.mxu1 %v1370_v23  ;;  %v1587_v58 = vld [vmem:[%s1828_s4] ss:$0 sm:$0xff] }
  0x10   :  { %1273 = vmatprep.subr.bf16.mxu1 %v1371_v25 }
  0x13   :  { %1274 = vmatpush3.bf16.msra.mxu1 %v1371_v25 }
  0x14   :  { %1275 = vmatprep.subr.bf16.mxu1 %v1372_v31 }
  0x16   :  { %1244 = vmatmul.mubr.msk.bf16.gmra.mrb[8].mxu0 %vm75_vm1, %v59_v24 }
  0x17   :  { %1247 = vmatprep.mubr.msk.bf16.mxu0 %vm75_vm1, %v60_v26  ;;  %1276 = vmatpush3.bf16.msra.mxu1 %v1372_v31 }
  0x18   :  { %1277 = vmatprep.subr.bf16.mxu1 %v1373_v33 }
  0x1b   :  { %1278 = vmatpush3.bf16.msra.mxu1 %v1373_v33 }
  0x1c   :  { %1279 = vmatprep.subr.bf16.mxu1 %v1374_v56 }
  0x1e   :  { %1248 = vmatmul.mubr.msk.bf16.gmra.mrb[12].mxu0 %vm75_vm1, %v61_v32 }
  0x1f   :  { %1251 = vmatprep.mubr.msk.bf16.mxu0 %vm75_vm1, %v62_v34  ;;  %1280 = vmatpush3.bf16.msra.mxu1 %v1374_v56 }
  0x20   :  { %1281 = vmatprep.subr.bf16.mxu1 %v1375_v57 }
  0x23   :  { %1282 = vmatpush3.bf16.msra.mxu1 %v1375_v57 }
  0x26   :  { %1252 = vmatmul.mubr.msk.bf16.gmra.mrb[16].mxu0 %vm75_vm1, %v63_v39 }
  0x27   :  { %1255 = vmatprep.mubr.msk.bf16.mxu0 %vm75_vm1, %v64_v40 }
  0x2e   :  { %1256 = vmatmul.mubr.msk.bf16.gmra.mrb[20].mxu0 %vm75_vm1, %v65_v45 }
  0x2f   :  { %1259 = vmatprep.mubr.msk.bf16.mxu0 %vm75_vm1, %v66_v46 }
  0x36   :  { %1260 = vmatmul.mubr.msk.bf16.gmra.mrb[24].mxu0 %vm75_vm1, %v67_v51 }
  0x37   :  { %1263 = vmatprep.mubr.msk.bf16.mxu0 %vm75_vm1, %v68_v52 }
  0x3e   :  { %1264 = vmatmul.mubr.msk.bf16.gmra.mrb[28].mxu0 %vm75_vm1, %v69_v55 }
  0xd9   :  { %v1237_v59 = vpop.f32.mrb[0].mxu0 }
  0xda   :  { %v171_v60 = vadd.f32 %v1237_v59, %v1587_v58  ;;  %v162_v61 = vpop.f32.mrb[1].mxu0 }
  0xdb   :  { %v163_v62 = vadd.f32 %v1587_v58, %v162_v61  ;;  %v1238_v63 = vpop.f32.mrb[2].mxu0 }
  0xdc   :  { %v174_v0 = vadd.f32 %v1238_v63, %v1587_v58  ;;  %v165_v1 = vpop.f32.mrb[3].mxu0  ;;  %v291_v3 = vmax.f32 %v171_v60, 0.0 }
  0xdd   :  { %v166_v2 = vadd.f32 %v1587_v58, %v165_v1  ;;  %v289_v5 = vmax.f32 %v163_v62, 0.0 }
  0xde   :  { %v292_v4 = vmax.f32 %v174_v0, 0.0 }
  0xdf   :  { %v290_v6 = vmax.f32 %v166_v2, 0.0 }
  0xe0   :  { %v338_v7 = vpack.c.bf16 %v292_v4, %v291_v3 }
  0xe1   :  { %v1241_v8 = vpop.f32.mrb[4].mxu0  ;;  %v337_v9 = vpack.c.bf16 %v290_v6, %v289_v5 }
  0xe2   :  { %v187_v10 = vadd.f32 %v1241_v8, %v1587_v58  ;;  %v178_v11 = vpop.f32.mrb[5].mxu0 }
  0xe3   :  { %v179_v12 = vadd.f32 %v1587_v58, %v178_v11  ;;  %v1242_v13 = vpop.f32.mrb[6].mxu0  ;;  %1283 = vmatprep.mubr.bf16.mxu1 %v337_v9 }
  0xe4   :  { %v190_v14 = vadd.f32 %v1242_v13, %v1587_v58  ;;  %v181_v15 = vpop.f32.mrb[7].mxu0  ;;  %1284 = vmatmul.mubr.bf16.vlgmr.msra.gmra.mrb[0].mxu1 %v338_v7  ;;  %v295_v17 = vmax.f32 %v187_v10, 0.0 }
  0xe5   :  { %v182_v16 = vadd.f32 %v1587_v58, %v181_v15  ;;  %v293_v19 = vmax.f32 %v179_v12, 0.0 }
  0xe6   :  { %v296_v18 = vmax.f32 %v190_v14, 0.0 }
  0xe7   :  { %v294_v20 = vmax.f32 %v182_v16, 0.0 }
  0xe8   :  { %v340_v21 = vpack.c.bf16 %v296_v18, %v295_v17 }
  0xe9   :  { %v339_v22 = vpack.c.bf16 %v294_v20, %v293_v19  ;;  %v1245_v23 = vpop.f32.mrb[8].mxu0 }
  0xea   :  { %v203_v24 = vadd.f32 %v1245_v23, %v1587_v58  ;;  %v194_v25 = vpop.f32.mrb[9].mxu0 }
  0xeb   :  { %v195_v26 = vadd.f32 %v1587_v58, %v194_v25  ;;  %v1246_v27 = vpop.f32.mrb[10].mxu0  ;;  %1287 = vmatprep.mubr.bf16.mxu1 %v339_v22 }
  0xec   :  { %v206_v28 = vadd.f32 %v1246_v27, %v1587_v58  ;;  %v197_v29 = vpop.f32.mrb[11].mxu0  ;;  %1288 = vmatmul.mubr.bf16.gmra.mrb[4].mxu1 %v340_v21  ;;  %v299_v31 = vmax.f32 %v203_v24, 0.0 }
  0xed   :  { %v198_v30 = vadd.f32 %v1587_v58, %v197_v29  ;;  %v297_v33 = vmax.f32 %v195_v26, 0.0 }
  0xee   :  { %v300_v32 = vmax.f32 %v206_v28, 0.0 }
  0xef   :  { %v298_v34 = vmax.f32 %v198_v30, 0.0 }
  0xf0   :  { %v342_v35 = vpack.c.bf16 %v300_v32, %v299_v31 }
  0xf1   :  { %v341_v36 = vpack.c.bf16 %v298_v34, %v297_v33  ;;  %v1249_v37 = vpop.f32.mrb[12].mxu0 }
  0xf2   :  { %v219_v38 = vadd.f32 %v1249_v37, %v1587_v58  ;;  %v210_v39 = vpop.f32.mrb[13].mxu0 }
  0xf3   :  { %v211_v40 = vadd.f32 %v1587_v58, %v210_v39  ;;  %v1250_v41 = vpop.f32.mrb[14].mxu0  ;;  %1291 = vmatprep.mubr.bf16.mxu1 %v341_v36 }
  0xf4   :  { %v222_v42 = vadd.f32 %v1250_v41, %v1587_v58  ;;  %v213_v43 = vpop.f32.mrb[15].mxu0  ;;  %1292 = vmatmul.mubr.bf16.gmra.mrb[8].mxu1 %v342_v35  ;;  %v303_v45 = vmax.f32 %v219_v38, 0.0 }
  0xf5   :  { %v214_v44 = vadd.f32 %v1587_v58, %v213_v43  ;;  %v301_v47 = vmax.f32 %v211_v40, 0.0 }
  0xf6   :  { %v304_v46 = vmax.f32 %v222_v42, 0.0 }
  0xf7   :  { %v302_v48 = vmax.f32 %v214_v44, 0.0  ;;  %v1376_v44 = vld [vmem:[%s1826_s2 + $0x48] sm:$0xff]  }
  0xf8   :  { %v344_v49 = vpack.c.bf16 %v304_v46, %v303_v45  ;;  %v1407_v45 = vmov 0   ;;  %v1378_v46 = vld [vmem:[%s1826_s2 + $0x58] sm:$0xff]  }
  0xf9   :  { %v343_v50 = vpack.c.bf16 %v302_v48, %v301_v47  ;;  %v1253_v51 = vpop.f32.mrb[16].mxu0  ;;  %711 = vmatprep.subr.bf16.mxu0 %v1407_v45  ;;  %v1379_v47 = vld [vmem:[%s1826_s2 + $0x60] sm:$0xff]   ;;  %v1380_v48 = vld [vmem:[%s1826_s2 + $0x68] sm:$0xff]  }
  0xfa   :  { %v235_v52 = vadd.f32 %v1253_v51, %v1587_v58  ;;  %v226_v53 = vpop.f32.mrb[17].mxu0  ;;  %712 = vmatpush1.bf16.msra.mxu0 %v1376_v44  ;;  %v1383_v51 = vld [vmem:[%s1826_s2 + $0x80] sm:$0xff]  }
  0xfb   :  { %v227_v54 = vadd.f32 %v1587_v58, %v226_v53  ;;  %v1254_v55 = vpop.f32.mrb[18].mxu0  ;;  %1295 = vmatprep.mubr.bf16.mxu1 %v343_v50  ;;  %713 = vmatprep.subr.bf16.mxu0 %v1407_v45  ;;  %v1382_v50 = vld [vmem:[%s1826_s2 + $0x78] sm:$0xff]   ;;  %v1385_v53 = vld [vmem:[%s1826_s2 + $0x90] sm:$0xff]  }
  0xfc   :  { %v238_v56 = vadd.f32 %v1254_v55, %v1587_v58  ;;  %v229_v57 = vpop.f32.mrb[19].mxu0  ;;  %1296 = vmatmul.mubr.bf16.gmra.mrb[12].mxu1 %v344_v49  ;;  %v307_v60 = vmax.f32 %v235_v52, 0.0  ;;  %v1381_v49 = vld [vmem:[%s1826_s2 + $0x70] sm:$0xff]   ;;  %v1384_v52 = vld [vmem:[%s1826_s2 + $0x88] sm:$0xff]  }
  0xfd   :  { %v230_v59 = vadd.f32 %v1587_v58, %v229_v57  ;;  %v305_v62 = vmax.f32 %v227_v54, 0.0  ;;  %v1664_v54 = vld [vmem:[%s1829_s1] sm:$0x3] }
  0xfe   :  { %v308_v61 = vmax.f32 %v238_v56, 0.0  ;;  %v641_v55 = vpack.c.bf16 %v1664_v54, %v1664_v54  ;;  %v1408_v56 = vmov 0.0   ;;  %v1673_v57 = vld [vmem:[%s1830_s3] sm:$0xff]   ;;  %866 = vrot.lane.b32.xlu0 %v1664_v54, %s1410_s13  ;;  %875 = vrot.lane.b32.xlu1 %v1664_v54, %s1411_s18 }
  0xff   :  { %v306_v63 = vmax.f32 %v230_v59, 0.0  ;;  %1315 = vmatprep.subr.bf16.mxu1 %v1408_v56  ;;  %v1680_v59 = vld [vmem:[%s1830_s3 + $0x8] sm:$0xff]  }
 0x100   :  { %v346_v0 = vpack.c.bf16 %v308_v61, %v307_v60  ;;  %1148 = vmatprep.mubr.msk.bf16.mxu0 %vm707_vm2, %v641_v55  ;;  %1316 = vmatpush3.bf16.msra.mxu1 %v1673_v57  ;;  %v1687_v60 = vld [vmem:[%s1830_s3 + $0x10] sm:$0xff]   ;;  %v1694_v61 = vld [vmem:[%s1830_s3 + $0x18] sm:$0xff]  }
 0x101   :  { %v345_v1 = vpack.c.bf16 %v306_v63, %v305_v62  ;;  %v1257_v2 = vpop.f32.mrb[20].mxu0  ;;  %1317 = vmatprep.subr.bf16.mxu1 %v1408_v56  ;;  %v1701_v62 = vld [vmem:[%s1830_s3 + $0x20] sm:$0xff]   ;;  %v1708_v63 = vld [vmem:[%s1830_s3 + $0x28] sm:$0xff]  }
 0x102   :  { %v251_v3 = vadd.f32 %v1257_v2, %v1587_v58  ;;  %v242_v4 = vpop.f32.mrb[21].mxu0 }
 0x103   :  { %v243_v5 = vadd.f32 %v1587_v58, %v242_v4  ;;  %v1258_v6 = vpop.f32.mrb[22].mxu0  ;;  %1299 = vmatprep.mubr.bf16.mxu1 %v345_v1  ;;  %v1722_v1 = vld [vmem:[%s1830_s3 + $0x38] sm:$0xff]  }
 0x104   :  { %v254_v7 = vadd.f32 %v1258_v6, %v1587_v58  ;;  %v245_v8 = vpop.f32.mrb[23].mxu0  ;;  %1300 = vmatmul.mubr.bf16.gmra.mrb[16].mxu1 %v346_v0  ;;  %v311_v10 = vmax.f32 %v251_v3, 0.0  ;;  %v1715_v0 = vld [vmem:[%s1830_s3 + $0x30] sm:$0xff]  }
 0x105   :  { %v246_v9 = vadd.f32 %v1587_v58, %v245_v8  ;;  %v309_v12 = vmax.f32 %v243_v5, 0.0  ;;  %1318 = vmatpush3.bf16.msra.mxu1 %v1680_v59 }
 0x106   :  { %v312_v11 = vmax.f32 %v254_v7, 0.0  ;;  %1319 = vmatprep.subr.bf16.mxu1 %v1408_v56 }
 0x107   :  { %v310_v13 = vmax.f32 %v246_v9, 0.0 }
 0x108   :  { %v348_v14 = vpack.c.bf16 %v312_v11, %v311_v10 }
 0x109   :  { %v347_v15 = vpack.c.bf16 %v310_v13, %v309_v12  ;;  %v1261_v16 = vpop.f32.mrb[24].mxu0  ;;  %1320 = vmatpush3.bf16.msra.mxu1 %v1687_v60 }
 0x10a   :  { %v267_v17 = vadd.f32 %v1261_v16, %v1587_v58  ;;  %v258_v18 = vpop.f32.mrb[25].mxu0  ;;  %1321 = vmatprep.subr.bf16.mxu1 %v1408_v56 }
 0x10b   :  { %v259_v19 = vadd.f32 %v1587_v58, %v258_v18  ;;  %v1262_v20 = vpop.f32.mrb[26].mxu0  ;;  %1303 = vmatprep.mubr.bf16.mxu1 %v347_v15 }
 0x10c   :  { %v270_v21 = vadd.f32 %v1262_v20, %v1587_v58  ;;  %v261_v22 = vpop.f32.mrb[27].mxu0  ;;  %1304 = vmatmul.mubr.bf16.gmra.mrb[20].mxu1 %v348_v14  ;;  %v315_v24 = vmax.f32 %v267_v17, 0.0 }
 0x10d   :  { %v262_v23 = vadd.f32 %v1587_v58, %v261_v22  ;;  %v313_v26 = vmax.f32 %v259_v19, 0.0  ;;  %1322 = vmatpush3.bf16.msra.mxu1 %v1694_v61 }
 0x10e   :  { %v316_v25 = vmax.f32 %v270_v21, 0.0  ;;  %1323 = vmatprep.subr.bf16.mxu1 %v1408_v56 }
 0x10f   :  { %v314_v27 = vmax.f32 %v262_v23, 0.0 }
 0x110   :  { %v350_v28 = vpack.c.bf16 %v316_v25, %v315_v24 }
 0x111   :  { %v349_v29 = vpack.c.bf16 %v314_v27, %v313_v26  ;;  %v1265_v30 = vpop.f32.mrb[28].mxu0  ;;  %1324 = vmatpush3.bf16.msra.mxu1 %v1701_v62 }
 0x112   :  { %v283_v31 = vadd.f32 %v1265_v30, %v1587_v58  ;;  %v274_v32 = vpop.f32.mrb[29].mxu0  ;;  %1325 = vmatprep.subr.bf16.mxu1 %v1408_v56 }
 0x113   :  { %v275_v33 = vadd.f32 %v1587_v58, %v274_v32  ;;  %v1266_v34 = vpop.f32.mrb[30].mxu0  ;;  %1307 = vmatprep.mubr.bf16.mxu1 %v349_v29 }
 0x114   :  { %v286_v35 = vadd.f32 %v1266_v34, %v1587_v58  ;;  %v277_v36 = vpop.f32.mrb[31].mxu0  ;;  %1308 = vmatmul.mubr.bf16.gmra.mrb[24].mxu1 %v350_v28  ;;  %v319_v38 = vmax.f32 %v283_v31, 0.0 }
 0x115   :  { %v278_v37 = vadd.f32 %v1587_v58, %v277_v36  ;;  %v317_v40 = vmax.f32 %v275_v33, 0.0  ;;  %v1377_v58 = vld [vmem:[%s1826_s2 + $0x50] sm:$0xff]   ;;  %1326 = vmatpush3.bf16.msra.mxu1 %v1708_v63 }
 0x116   :  { %v320_v39 = vmax.f32 %v286_v35, 0.0  ;;  %714 = vmatpush1.bf16.msra.mxu0 %v1377_v58  ;;  %1327 = vmatprep.subr.bf16.mxu1 %v1408_v56 }
 0x117   :  { %v318_v41 = vmax.f32 %v278_v37, 0.0  ;;  %715 = vmatprep.subr.bf16.mxu0 %v1407_v45 }
 0x118   :  { %v352_v42 = vpack.c.bf16 %v320_v39, %v319_v38 }
 0x119   :  { %v351_v43 = vpack.c.bf16 %v318_v41, %v317_v40  ;;  %1328 = vmatpush3.bf16.msra.mxu1 %v1715_v0 }
 0x11a   :  { %716 = vmatpush1.bf16.msra.mxu0 %v1378_v46  ;;  %1329 = vmatprep.subr.bf16.mxu1 %v1408_v56 }
 0x11b   :  { %1311 = vmatprep.mubr.bf16.mxu1 %v351_v43  ;;  %717 = vmatprep.subr.bf16.mxu0 %v1407_v45 }
 0x11c   :  { %1312 = vmatmul.mubr.bf16.gmra.mrb[28].mxu1 %v352_v42 }
 0x11d   :  { %1330 = vmatpush3.bf16.msra.mxu1 %v1722_v1  ;;  %1331 = vmatprep.mubr.msk.bf16.mxu1 %vm1409_vm4, %v1408_v56 }
 0x11e   :  { %718 = vmatpush1.bf16.msra.mxu0 %v1379_v47  ;;  %1341 = vmatprep.subr.bf16.mxu1 %v1408_v56 }
 0x11f   :  { %719 = vmatprep.subr.bf16.mxu0 %v1407_v45 }
 0x122   :  { %720 = vmatpush1.bf16.msra.mxu0 %v1380_v48 }
 0x123   :  { %721 = vmatprep.subr.bf16.mxu0 %v1407_v45 }
 0x126   :  { %722 = vmatpush1.bf16.msra.mxu0 %v1381_v49 }
 0x127   :  { %723 = vmatprep.subr.bf16.mxu0 %v1407_v45 }
 0x12a   :  { %724 = vmatpush1.bf16.msra.mxu0 %v1382_v50 }
 0x12b   :  { %725 = vmatprep.subr.bf16.mxu0 %v1407_v45 }
 0x12e   :  { %726 = vmatpush1.bf16.msra.mxu0 %v1383_v51 }
 0x12f   :  { %727 = vmatprep.subr.bf16.mxu0 %v1407_v45 }
 0x132   :  { %728 = vmatpush1.bf16.msra.mxu0 %v1384_v52 }
 0x133   :  { %729 = vmatprep.subr.bf16.mxu0 %v1407_v45 }
 0x136   :  { %730 = vmatpush1.bf16.msra.mxu0 %v1385_v53 }
 0x137   :  { %1335 = vmatprep.subr.bf16.mxu0 %v1408_v56 }
 0x170   :  { %v867_v54 = vpop.permute.xlu0 %866 }
 0x1b7   :  { %v1285_v2 = vpop.f32.mrb[0].mxu1 }
 0x1b8   :  { %v435_v3 = vpop.f32.mrb[1].mxu1 }
 0x1b9   :  { %v562_v4 = vmax.f32 %v435_v3, %v1285_v2  ;;  %v1286_v5 = vpop.f32.mrb[2].mxu1 }
 0x1ba   :  { %v438_v6 = vpop.f32.mrb[3].mxu1 }
 0x1bb   :  { %v563_v7 = vmax.f32 %v438_v6, %v1286_v5 }
 0x1bf   :  { %v1289_v8 = vpop.f32.mrb[4].mxu1 }
 0x1c0   :  { %v451_v9 = vpop.f32.mrb[5].mxu1 }
 0x1c1   :  { %v564_v10 = vmax.f32 %v562_v4, %v451_v9  ;;  %v1290_v11 = vpop.f32.mrb[6].mxu1 }
 0x1c2   :  { %v454_v12 = vpop.f32.mrb[7].mxu1 }
 0x1c3   :  { %v565_v13 = vmax.f32 %v563_v7, %v454_v12  ;;  %v566_v14 = vmax.f32 %v564_v10, %v1289_v8 }
 0x1c5   :  { %v567_v15 = vmax.f32 %v565_v13, %v1290_v11 }
 0x1c7   :  { %v1293_v16 = vpop.f32.mrb[8].mxu1 }
 0x1c8   :  { %v467_v17 = vpop.f32.mrb[9].mxu1 }
 0x1c9   :  { %v568_v18 = vmax.f32 %v566_v14, %v467_v17  ;;  %v1294_v19 = vpop.f32.mrb[10].mxu1 }
 0x1ca   :  { %v470_v20 = vpop.f32.mrb[11].mxu1 }
 0x1cb   :  { %v569_v21 = vmax.f32 %v567_v15, %v470_v20  ;;  %v570_v22 = vmax.f32 %v568_v18, %v1293_v16 }
 0x1cd   :  { %v571_v23 = vmax.f32 %v569_v21, %v1294_v19 }
 0x1cf   :  { %v1297_v24 = vpop.f32.mrb[12].mxu1 }
 0x1d0   :  { %v483_v25 = vpop.f32.mrb[13].mxu1 }
 0x1d1   :  { %v572_v26 = vmax.f32 %v570_v22, %v483_v25  ;;  %v1298_v27 = vpop.f32.mrb[14].mxu1  ;;  %v1136_v22 = vld [vmem:[%s1828_s4 + $0x1] ss:$0 sm:$0xff] }
 0x1d2   :  { %v486_v28 = vpop.f32.mrb[15].mxu1 }
 0x1d3   :  { %v574_v29 = vmax.f32 %v572_v26, %v1297_v24  ;;  %v573_v30 = vmax.f32 %v571_v23, %v486_v28 }
 0x1d5   :  { %v575_v31 = vmax.f32 %v573_v30, %v1298_v27 }
 0x1d7   :  { %v576_v32 = vmax.f32 %v574_v29, %v575_v31  ;;  %v1301_v33 = vpop.f32.mrb[16].mxu1  ;;  %v1137_v31 = vld [vmem:[%s1828_s4 + $0x2] ss:$0 sm:$0xff] }
 0x1d8   :  { %v499_v34 = vpop.f32.mrb[17].mxu1 }
 0x1d9   :  { %v583_v35 = vmax.f32 %v499_v34, %v1301_v33  ;;  %v1302_v36 = vpop.f32.mrb[18].mxu1  ;;  %v577_v55 = vrot.slane %v576_v32, 4 }
 0x1da   :  { %v502_v37 = vpop.f32.mrb[19].mxu1 }
 0x1db   :  { %v584_v38 = vmax.f32 %v502_v37, %v1302_v36  ;;  %v578_v5 = vmax.f32 %v576_v32, %v577_v55  ;;  %v1403_v55 = vld [vmem:[%s1826_s2 + $0xd8] sm:$0xff]  }
 0x1dd   :  { %v579_v11 = vrot.slane %v578_v5, 2 }
 0x1df   :  { %v1305_v39 = vpop.f32.mrb[20].mxu1  ;;  %v580_v14 = vmax.f32 %v578_v5, %v579_v11 }
 0x1e0   :  { %v515_v40 = vpop.f32.mrb[21].mxu1 }
 0x1e1   :  { %v585_v41 = vmax.f32 %v583_v35, %v515_v40  ;;  %v1306_v42 = vpop.f32.mrb[22].mxu1  ;;  %v581_v17 = vrot.slane %v580_v14, 1 }
 0x1e2   :  { %v518_v43 = vpop.f32.mrb[23].mxu1 }
 0x1e3   :  { %v586_v44 = vmax.f32 %v584_v38, %v518_v43  ;;  %v587_v58 = vmax.f32 %v585_v41, %v1305_v39  ;;  %v582_v20 = vmax.f32 %v580_v14, %v581_v17  ;;  %v876_v41 = vpop.permute.xlu1 %875 }
 0x1e5   :  { %v588_v46 = vmax.f32 %v586_v44, %v1306_v42  ;;  %v609_v24 = vadd.f32 %v1136_v22, %v582_v20  ;;  %v1395_v44 = vld [vmem:[%s1826_s2 + $0x98] sm:$0xff]  }
 0x1e7   :  { %v1309_v47 = vpop.f32.mrb[24].mxu1  ;;  %v611_v27 = vmax.f32 %v609_v24, 0.0 }
 0x1e8   :  { %v531_v48 = vpop.f32.mrb[25].mxu1 }
 0x1e9   :  { %v589_v49 = vmax.f32 %v587_v58, %v531_v48  ;;  %v1310_v50 = vpop.f32.mrb[26].mxu1  ;;  %v899_v58 = vpack.c.bf16 %v876_v41, %v876_v41  ;;  %v1397_v48 = vld [vmem:[%s1826_s2 + $0xa8] sm:$0xff]  }
 0x1ea   :  { %v534_v51 = vpop.f32.mrb[27].mxu1 }
 0x1eb   :  { %v590_v52 = vmax.f32 %v588_v46, %v534_v51  ;;  %v591_v53 = vmax.f32 %v589_v49, %v1309_v47  ;;  %v1396_v47 = vld [vmem:[%s1826_s2 + $0xa0] sm:$0xff]   ;;  %v1398_v49 = vld [vmem:[%s1826_s2 + $0xb0] sm:$0xff]  }
 0x1ec   :  { %v1400_v51 = vld [vmem:[%s1826_s2 + $0xc0] sm:$0xff]  }
 0x1ed   :  { %v592_v2 = vmax.f32 %v590_v52, %v1310_v50  ;;  %v1399_v50 = vld [vmem:[%s1826_s2 + $0xb8] sm:$0xff]   ;;  %v1401_v52 = vld [vmem:[%s1826_s2 + $0xc8] sm:$0xff]  }
 0x1ef   :  { %v1313_v3 = vpop.f32.mrb[28].mxu1 }
 0x1f0   :  { %v547_v4 = vpop.f32.mrb[29].mxu1 }
 0x1f1   :  { %v593_v6 = vmax.f32 %v591_v53, %v547_v4  ;;  %v1314_v7 = vpop.f32.mrb[30].mxu1  ;;  %v1402_v53 = vld [vmem:[%s1826_s2 + $0xd0] sm:$0xff]  }
 0x1f2   :  { %v550_v8 = vpop.f32.mrb[31].mxu1 }
 0x1f3   :  { %v595_v9 = vmax.f32 %v593_v6, %v1313_v3  ;;  %v594_v10 = vmax.f32 %v592_v2, %v550_v8  ;;  %v1404_v2 = vld [vmem:[%s1826_s2 + $0xe0] ss:$0 sps:$4 sm:$0xff]  }
 0x1f4   :  { %v1013_v3 = vsel %vm124_vm0, %v1404_v2, 0 }
 0x1f5   :  { %v596_v12 = vmax.f32 %v594_v10, %v1314_v7 }
 0x1f7   :  { %v597_v13 = vmax.f32 %v595_v9, %v596_v12  ;;  %v1171_v9 = vld [vmem:[%s1828_s4 + $0x3] ss:$0 sm:$0xff] }
 0x1f9   :  { %v598_v15 = vrot.slane %v597_v13, 4 }
 0x1fb   :  { %v599_v16 = vmax.f32 %v597_v13, %v598_v15 }
 0x1fd   :  { %v600_v18 = vrot.slane %v599_v16, 2 }
 0x1ff   :  { %v601_v19 = vmax.f32 %v599_v16, %v600_v18 }
 0x201   :  { %v602_v21 = vrot.slane %v601_v19, 1 }
 0x203   :  { %v603_v23 = vmax.f32 %v601_v19, %v602_v21 }
 0x205   :  { %v610_v25 = vadd.f32 %v1136_v22, %v603_v23 }
 0x207   :  { %v612_v26 = vmax.f32 %v610_v25, 0.0 }
 0x209   :  { %v616_v28 = vrot.slane %v612_v26, 7 }
 0x20b   :  { %v618_v29 = vsel %vm617_vm3, %v616_v28, %v611_v27 }
 0x20c   :  { %v1730_v30 = vpack.c.bf16 %v618_v29, %v618_v29 }
 0x20e   :  { %744 = vmatmul.mubr.bf16.vlgmr.msra.gmra.mrb[32].mxu0 %v1730_v30 }
 0x20f   :  { %1337 = vmatprep.mubr.msk.bf16.mxu0 %vm1409_vm4, %v1408_v56 }
 0x2e1   :  { %v745_v32 = vpop.f32.mrb[32].mxu0 }
 0x2e2   :  { %v746_v33 = vadd.f32 %v1137_v31, %v745_v32  ;;  %v747_v34 = vpop.f32.mrb[33].mxu0 }
 0x2e3   :  { %v748_v35 = vpop.f32.mrb[34].mxu0 }
 0x2e4   :  { %v751_v36 = vmax.f32 %v746_v33, 0.0  ;;  %v749_v37 = vpop.f32.mrb[35].mxu0 }
 0x2e6   :  { %v753_v38 = vpack.c.bf16 %v751_v36, %v751_v36 }
 0x2e8   :  { %1332 = vmatmul.mubr.bf16.vlgmr.msra.gmra.mrb[32].mxu1 %v753_v38 }
 0x2e9   :  { %1342 = vmatpush3.bf16.msra.mxu1 %v1673_v57  ;;  %1357 = vmatprep.mubr.msk.bf16.mxu1 %vm1409_vm4, %v1408_v56  ;;  %v1394_v57 = vld [vmem:[%s1826_s2 + $0xe8] sm:$0xff]  }
 0x2ea   :  { %1343 = vmatprep.subr.bf16.mxu1 %v1408_v56  ;;  %1336 = vmatpush3.bf16.msra.mxu0 %v1394_v57 }
 0x2eb   :  { %1015 = vmatprep.subr.bf16.mxu0 %v1407_v45 }
 0x2ed   :  { %1344 = vmatpush3.bf16.msra.mxu1 %v1680_v59  ;;  %v1763_v59 = vld [vmem:[%s1828_s4 + $0x4] ss:$0 sm:$0xff] }
 0x2ee   :  { %1345 = vmatprep.subr.bf16.mxu1 %v1408_v56 }
 0x2f1   :  { %1346 = vmatpush3.bf16.msra.mxu1 %v1687_v60 }
 0x2f2   :  { %1347 = vmatprep.subr.bf16.mxu1 %v1408_v56 }
 0x2f5   :  { %1348 = vmatpush3.bf16.msra.mxu1 %v1694_v61 }
 0x2f6   :  { %1349 = vmatprep.subr.bf16.mxu1 %v1408_v56 }
 0x2f9   :  { %1350 = vmatpush3.bf16.msra.mxu1 %v1701_v62 }
 0x2fa   :  { %1351 = vmatprep.subr.bf16.mxu1 %v1408_v56 }
 0x2fd   :  { %1352 = vmatpush3.bf16.msra.mxu1 %v1708_v63 }
 0x2fe   :  { %1353 = vmatprep.subr.bf16.mxu1 %v1408_v56 }
 0x301   :  { %1354 = vmatpush3.bf16.msra.mxu1 %v1715_v0 }
 0x302   :  { %1355 = vmatprep.subr.bf16.mxu1 %v1408_v56 }
 0x305   :  { %1356 = vmatpush3.bf16.msra.mxu1 %v1722_v1 }
 0x3bb   :  { %v856_v60 = vpop.f32.mrb[32].mxu1 }
 0x3bc   :  { %v1766_v56 = vadd.f32 %v1763_v59, %v856_v60  ;;  %v1333_v61 = vpop.f32.mrb[33].mxu1 }
 0x3bd   :  { %v859_v62 = vpop.f32.mrb[34].mxu1 }
 0x3be   :  { %v862_v63 = vmul.f32 0.5, %v1766_v56  ;;  %v1334_v0 = vpop.f32.mrb[35].mxu1 }
 0x3c0   :  { %v863_v1 = vmul.f32 1.442695, %v862_v63 }
 0x3c2   :  { %1405 = vpow2.f32 %v863_v1 }
 0x3cc   :  { %v1769_v39 = vpop.eup %1405 }
 0x3cd   :  { %v869_v40 = vmul.f32 %v1769_v39, %v867_v54  ;;  %v1103_v19 = vsel %vm907_vm6, %v1766_v56, %v1769_v39 }
 0x3cf   :  { %871 = vrot.lane.b32.xlu0 %v869_v40, %s1412_s21 }
 0x441   :  { %v872_v42 = vpop.permute.xlu0 %871 }
 0x442   :  { %v874_v43 = vadd.f32 %v872_v42, %v1766_v56 }
 0x444   :  { %v900_v46 = vpack.c.bf16 %v874_v43, %v874_v43 }
 0x446   :  { %1338 = vmatmul.mubr.msk.bf16.vlgmr.msra.gmra.mrb[36].mxu0 %vm907_vm6, %v900_v46 }
 0x447   :  { %1016 = vmatpush1.bf16.msra.mxu0 %v1395_v44  ;;  %1170 = vmatprep.mubr.msk.bf16.mxu0 %vm1008_vm5, %v899_v58 }
 0x448   :  { %1017 = vmatprep.subr.bf16.mxu0 %v1407_v45 }
 0x44b   :  { %1018 = vmatpush1.bf16.msra.mxu0 %v1396_v47 }
 0x44c   :  { %1019 = vmatprep.subr.bf16.mxu0 %v1407_v45 }
 0x44f   :  { %1020 = vmatpush1.bf16.msra.mxu0 %v1397_v48 }
 0x450   :  { %1021 = vmatprep.subr.bf16.mxu0 %v1407_v45 }
 0x453   :  { %1022 = vmatpush1.bf16.msra.mxu0 %v1398_v49 }
 0x454   :  { %1023 = vmatprep.subr.bf16.mxu0 %v1407_v45 }
 0x457   :  { %1024 = vmatpush1.bf16.msra.mxu0 %v1399_v50 }
 0x458   :  { %1025 = vmatprep.subr.bf16.mxu0 %v1407_v45 }
 0x45b   :  { %1026 = vmatpush1.bf16.msra.mxu0 %v1400_v51 }
 0x45c   :  { %1027 = vmatprep.subr.bf16.mxu0 %v1407_v45 }
 0x45f   :  { %1028 = vmatpush1.bf16.msra.mxu0 %v1401_v52 }
 0x460   :  { %1029 = vmatprep.subr.bf16.mxu0 %v1407_v45 }
 0x463   :  { %1030 = vmatpush1.bf16.msra.mxu0 %v1402_v53 }
 0x464   :  { %1031 = vmatprep.subr.bf16.mxu0 %v1407_v45 }
 0x467   :  { %1032 = vmatpush1.bf16.msra.mxu0 %v1403_v55 }
 0x468   :  { %1033 = vmatprep.subr.bf16.mxu0 %v1407_v45 }
 0x46b   :  { %1034 = vmatpush1.bf16.msra.mxu0 %v1013_v3 }
 0x46e   :  { %1048 = vmatmul.mubr.bf16.vlgmr.msra.gmra.mrb[40].mxu0 %v1730_v30 }
 0x519   :  { %v945_v4 = vpop.f32.mrb[36].mxu0 }
 0x51a   :  { %v1339_v5 = vpop.f32.mrb[37].mxu0 }
 0x51b   :  { %v948_v6 = vpop.f32.mrb[38].mxu0 }
 0x51c   :  { %v1340_v7 = vpop.f32.mrb[39].mxu0 }
 0x541   :  { %v1049_v8 = vpop.f32.mrb[40].mxu0 }
 0x542   :  { %v1050_v10 = vadd.f32 %v1049_v8, %v945_v4  ;;  %v1051_v11 = vpop.f32.mrb[41].mxu0 }
 0x543   :  { %v1052_v12 = vpop.f32.mrb[42].mxu0 }
 0x544   :  { %v1060_v13 = vadd.f32 %v1171_v9, %v1050_v10  ;;  %v1053_v14 = vpop.f32.mrb[43].mxu0 }
 0x546   :  { %v1061_v45 = vmax.f32 %v1060_v13, 0.0 }
 0x548   :  { %v1062_v15 = vpack.c.bf16 %v1061_v45, %v1061_v45 }
 0x54a   :  { %1358 = vmatmul.mubr.bf16.vlgmr.msra.gmra.mrb[36].mxu1 %v1062_v15 }
 0x61d   :  { %v1097_v16 = vpop.f32.mrb[36].mxu1 }
 0x61e   :  { %v1098_v17 = vadd.f32 %v1763_v59, %v1097_v16  ;;  %v1359_v18 = vpop.f32.mrb[37].mxu1 }
 0x61f   :  { %v1100_v20 = vpop.f32.mrb[38].mxu1 }
 0x620   :  { %v1104_v21 = vsel %vm707_vm2, %v1103_v19, %v1098_v17  ;;  %v1360_v22 = vpop.f32.mrb[39].mxu1 }
 0x621   :  { %1106 = vst.msk [vmem:[%s1831_s5] sm:$0x3] %vm1105_vm7, %v1104_v21 }

</bundles_post_ra>
